<compile_context>
chip_gen: v6e
topology: v6e:2x2x1
jax: 0.10.0
libtpu: 0.0.40
codegen_flags: <defaults>
</compile_context>

<pallas_src>
import functools

import jax
import jax.numpy as jnp
from jax import lax
from jax.experimental import pallas as pl
from jax.experimental.pallas import tpu as pltpu


def _round_up(n, m):
    return ((n + m - 1) // m) * m


def _cdiv(a, b):
    return -(-a // b)


def _mlp_kernel(x_ref, w1_ref, b1_ref, w2_ref, b2_ref, w3_ref, b3_ref, o_ref,
                *, chunk, n_chunks, compute_dtype):
    """One batch tile: x_ref (30, tb), o_ref (1, tb), tb = chunk * n_chunks.

    Batch lives on the lane axis.  The inner (unrolled) loop walks `chunk`-lane
    sub-blocks so intermediates stay close to the vreg file even for large tiles.
    """
    w1 = w1_ref[...]            # (128, 30)  compute_dtype
    w2 = w2_ref[...]            # (64, 128)  compute_dtype
    b1 = b1_ref[...]            # (128, 1)   f32
    b2 = b2_ref[...]            # (64, 1)    f32
    w3 = w3_ref[...]            # (64, 1)    f32
    b3 = b3_ref[...]            # (1, 1)     f32

    def body(c, carry):
        start = pl.multiple_of(c * chunk, chunk)
        xc = x_ref[:, pl.ds(start, chunk)]                         # (30, chunk)
        # fc1 + ReLU: MXU matmul (f32 accumulate), bias/ReLU on the VPU in f32.
        h1 = jnp.dot(w1, xc, preferred_element_type=jnp.float32)   # (128, chunk)
        h1 = jnp.maximum(h1 + b1, 0.0)
        # fc2 + ReLU.
        h2 = jnp.dot(w2, h1.astype(compute_dtype),
                     preferred_element_type=jnp.float32)            # (64, chunk)
        h2 = jnp.maximum(h2 + b2, 0.0)
        # fc3 (out_features == 1): VPU multiply + sublane reduction, all f32.
        o = jnp.sum(h2 * w3, axis=0, keepdims=True) + b3            # (1, chunk)
        o_ref[:, pl.ds(start, chunk)] = o.astype(o_ref.dtype)
        return carry

    lax.fori_loop(0, n_chunks, body, 0, unroll=True)


def regression_net_forward(x, params, *, block_b=1024, use_bf16_matmul=True):
    """Forward pass of RegressionNet.

    x: [B, 30] float32.
    params (torch layout): w1 [128,30], b1 [128], w2 [64,128], b2 [64],
                           w3 [1,64],  b3 [1].
    Returns: [B, 1] float32 == relu(relu(x @ w1.T + b1) @ w2.T + b2) @ w3.T + b3.
    """
    CHUNK = 256
    assert block_b % CHUNK == 0, "block_b must be a multiple of 256"
    B, F = x.shape
    assert F == 30, f"expected 30 input features, got {F}"

    compute_dtype = jnp.bfloat16 if use_bf16_matmul else jnp.float32

    # Kernel-layout parameters: matmul weights in compute_dtype, everything
    # elementwise (biases, fc3 weight) stays f32.  Biases/w3 become columns so
    # they broadcast along the lane (batch) axis.
    w1 = params["w1"].astype(compute_dtype)                  # (128, 30)
    w2 = params["w2"].astype(compute_dtype)                  # (64, 128)
    b1 = params["b1"].astype(jnp.float32).reshape(128, 1)    # (128, 1)
    b2 = params["b2"].astype(jnp.float32).reshape(64, 1)     # (64, 1)
    w3 = params["w3"].astype(jnp.float32).reshape(64, 1)     # (64, 1)
    b3 = params["b3"].astype(jnp.float32).reshape(1, 1)      # (1, 1)

    # --- Batch tiling (batch on lanes) --------------------------------------
    # Work is counted in 256-lane chunks; padding is bounded to < 256 rows.
    # Pick chunks_per_tile as the largest divisor of total_chunks that fits
    # block_b and still leaves >= 2 grid steps when there are >= 2 chunks
    # (so v7x's two TensorCores both get tiles via the "parallel" grid axis).
    total_chunks = max(1, _cdiv(B, CHUNK))
    bp = total_chunks * CHUNK
    max_cpt = block_b // CHUNK
    min_tiles = 2 if total_chunks >= 2 else 1
    cpt = 1
    for c in range(min(max_cpt, total_chunks), 0, -1):
        if total_chunks % c == 0 and total_chunks // c >= min_tiles:
            cpt = c
            break
    tb = cpt * CHUNK
    n_tiles = bp // tb

    # Pre-transpose + pad + cast x in the wrapper (one cheap XLA pass over x).
    # TODO(synk): pass x already transposed from the producer, or enable
    # allow_input_fusion in CompilerParams, to avoid this extra HBM round trip.
    xp = jnp.pad(x.astype(compute_dtype).T, ((0, 0), (0, bp - B)))   # (30, bp)

    kernel = functools.partial(_mlp_kernel, chunk=CHUNK, n_chunks=cpt,
                               compute_dtype=compute_dtype)

    # Constant index_map -> block index never changes -> Pallas keeps the tiny
    # weights/biases resident in VMEM instead of re-DMAing them every grid step.
    const_spec = lambda a: pl.BlockSpec(a.shape, lambda i: (0, 0))

    out_row = pl.pallas_call(
        kernel,
        out_shape=jax.ShapeDtypeStruct((1, bp), jnp.float32),
        grid=(n_tiles,),
        in_specs=[
            pl.BlockSpec((30, tb), lambda i: (0, i)),   # x tiles: streamed & pipelined
            const_spec(w1), const_spec(b1),
            const_spec(w2), const_spec(b2),
            const_spec(w3), const_spec(b3),
        ],
        out_specs=pl.BlockSpec((1, tb), lambda i: (0, i)),  # lane-dense output row
        compiler_params=pltpu.CompilerParams(
            dimension_semantics=("parallel",),  # v7x: shard batch tiles across both TCs
        ),
    )(xp, w1, b1, w2, b2, w3, b3)

    return out_row[0, :B].reshape(B, 1)


def init_params(key):
    """Deterministic init mimicking nn.Linear default (uniform(+-1/sqrt(fan_in))),
    stored in torch layout: weight [out, in], bias [out]."""
    def linear(k, fan_in, fan_out):
        kw, kb = jax.random.split(k)
        bound = 1.0 / jnp.sqrt(jnp.float32(fan_in))
        w = jax.random.uniform(kw, (fan_out, fan_in), jnp.float32, -bound, bound)
        b = jax.random.uniform(kb, (fan_out,), jnp.float32, -bound, bound)
        return w, b

    k1, k2, k3 = jax.random.split(key, 3)
    w1, b1 = linear(k1, 30, 128)
    w2, b2 = linear(k2, 128, 64)
    w3, b3 = linear(k3, 64, 1)
    return {"w1": w1, "b1": b1, "w2": w2, "b2": b2, "w3": w3, "b3": b3}


def _reference_forward(x, params):
    h1 = jnp.maximum(x @ params["w1"].T + params["b1"], 0.0)
    h2 = jnp.maximum(h1 @ params["w2"].T + params["b2"], 0.0)
    return h2 @ params["w3"].T + params["b3"]


if __name__ == "__main__":
    key = jax.random.PRNGKey(0)
    kx, kp = jax.random.split(key)

    batch = 8
    x = jax.random.normal(kx, (batch, 30), jnp.float32)
    params = init_params(kp)

    ref = _reference_forward(x, params)

    # Default path: bf16 MXU operands, f32 accumulation / elementwise.
    out = jax.block_until_ready(regression_net_forward(x, params))
    assert out.shape == (batch, 1), out.shape
    assert jnp.allclose(out, ref, atol=3e-2, rtol=3e-2), "bf16-matmul path mismatch"

    # Exact-f32 path (tight tolerance vs. the f32 reference).
    out_f32 = jax.block_until_ready(
        regression_net_forward(x, params, use_bf16_matmul=False))
    assert out_f32.shape == (batch, 1), out_f32.shape
    assert jnp.allclose(out_f32, ref, atol=1e-4, rtol=1e-4), "f32 path mismatch"

    print("KERNEL_OK")
</pallas_src>

<mosaic_0001>
module attributes {stable_mosaic.version = 11 : i64} {
  func.func @_mlp_kernel(%arg0: i32, %arg1: memref<30x256xbf16, #tpu.memory_space<vmem>>, %arg2: memref<128x30xbf16, #tpu.memory_space<vmem>>, %arg3: memref<128x1xf32, #tpu.memory_space<vmem>>, %arg4: memref<64x128xbf16, #tpu.memory_space<vmem>>, %arg5: memref<64x1xf32, #tpu.memory_space<vmem>>, %arg6: memref<64x1xf32, #tpu.memory_space<vmem>>, %arg7: memref<1x1xf32, #tpu.memory_space<vmem>>, %arg8: memref<1x256xf32, #tpu.memory_space<vmem>>) attributes {dimension_semantics = [#tpu.dimension_semantics<parallel>], iteration_bounds = array<i64: 1>, scalar_prefetch = 0 : i64, scratch_operands = 0 : i64, tpu.core_type = #tpu.core_type<tc>, window_params = [{transform_indices = @transform_0, window_bounds = array<i64: 30, 256>}, {pipeline_mode = #tpu.pipeline_mode<synchronous>, transform_indices = @transform_1, window_bounds = array<i64: 128, 30>}, {pipeline_mode = #tpu.pipeline_mode<synchronous>, transform_indices = @transform_2, window_bounds = array<i64: 128, 1>}, {pipeline_mode = #tpu.pipeline_mode<synchronous>, transform_indices = @transform_3, window_bounds = array<i64: 64, 128>}, {pipeline_mode = #tpu.pipeline_mode<synchronous>, transform_indices = @transform_4, window_bounds = array<i64: 64, 1>}, {pipeline_mode = #tpu.pipeline_mode<synchronous>, transform_indices = @transform_5, window_bounds = array<i64: 64, 1>}, {pipeline_mode = #tpu.pipeline_mode<synchronous>, transform_indices = @transform_6, window_bounds = array<i64: 1, 1>}, {transform_indices = @transform_7, window_bounds = array<i64: 1, 256>}]} {
    %c0 = arith.constant 0 : index
    %c0_0 = arith.constant 0 : index
    %0 = vector.load %arg2[%c0, %c0_0] : memref<128x30xbf16, #tpu.memory_space<vmem>>, vector<128x30xbf16>
    %c0_1 = arith.constant 0 : index
    %c0_2 = arith.constant 0 : index
    %1 = vector.load %arg4[%c0_1, %c0_2] : memref<64x128xbf16, #tpu.memory_space<vmem>>, vector<64x128xbf16>
    %c0_3 = arith.constant 0 : index
    %c0_4 = arith.constant 0 : index
    %2 = vector.load %arg3[%c0_3, %c0_4] : memref<128x1xf32, #tpu.memory_space<vmem>>, vector<128x1xf32>
    %c0_5 = arith.constant 0 : index
    %c0_6 = arith.constant 0 : index
    %3 = vector.load %arg5[%c0_5, %c0_6] : memref<64x1xf32, #tpu.memory_space<vmem>>, vector<64x1xf32>
    %c0_7 = arith.constant 0 : index
    %c0_8 = arith.constant 0 : index
    %4 = vector.load %arg6[%c0_7, %c0_8] : memref<64x1xf32, #tpu.memory_space<vmem>>, vector<64x1xf32>
    %c0_9 = arith.constant 0 : index
    %c0_10 = arith.constant 0 : index
    %5 = vector.load %arg7[%c0_9, %c0_10] : memref<1x1xf32, #tpu.memory_space<vmem>>, vector<1x1xf32>
    %c0_i32 = arith.constant 0 : i32
    %c256_i32 = arith.constant 256 : i32
    %6 = arith.muli %c0_i32, %c256_i32 : i32
    %7 = tpu.assume_multiple %6, 256 : i32
    %c0_11 = arith.constant 0 : index
    %8 = arith.index_cast %7 : i32 to index
    %9 = vector.load %arg1[%c0_11, %8] : memref<30x256xbf16, #tpu.memory_space<vmem>>, vector<30x256xbf16>
    %cst = arith.constant dense<0.000000e+00> : vector<128x256xf32>
    %10 = tpu.matmul %0, %9, %cst {dimension_numbers = #tpu.dot_dimension_numbers<[1], [0], [0], [1], [0, 0, 1, 1], [], []>} : vector<128x30xbf16>, vector<30x256xbf16>, vector<128x256xf32> -> vector<128x256xf32>
    %11 = vector.broadcast %2 : vector<128x1xf32> to vector<128x256xf32>
    %12 = arith.addf %10, %11 : vector<128x256xf32>
    %cst_12 = arith.constant 0.000000e+00 : f32
    %13 = vector.broadcast %cst_12 : f32 to vector<128x256xf32>
    %14 = arith.maximumf %12, %13 : vector<128x256xf32>
    %15 = arith.truncf %14 : vector<128x256xf32> to vector<128x256xbf16>
    %cst_13 = arith.constant dense<0.000000e+00> : vector<64x256xf32>
    %16 = tpu.matmul %1, %15, %cst_13 {dimension_numbers = #tpu.dot_dimension_numbers<[1], [0], [0], [1], [0, 0, 1, 1], [], []>} : vector<64x128xbf16>, vector<128x256xbf16>, vector<64x256xf32> -> vector<64x256xf32>
    %17 = vector.broadcast %3 : vector<64x1xf32> to vector<64x256xf32>
    %18 = arith.addf %16, %17 : vector<64x256xf32>
    %cst_14 = arith.constant 0.000000e+00 : f32
    %19 = vector.broadcast %cst_14 : f32 to vector<64x256xf32>
    %20 = arith.maximumf %18, %19 : vector<64x256xf32>
    %21 = vector.broadcast %4 : vector<64x1xf32> to vector<64x256xf32>
    %22 = arith.mulf %20, %21 : vector<64x256xf32>
    %cst_15 = arith.constant dense<0.000000e+00> : vector<256xf32>
    %23 = vector.multi_reduction <add>, %22, %cst_15 [0] : vector<64x256xf32> to vector<256xf32>
    %24 = vector.shape_cast %23 : vector<256xf32> to vector<1x256xf32>
    %25 = vector.broadcast %5 : vector<1x1xf32> to vector<1x256xf32>
    %26 = arith.addf %24, %25 : vector<1x256xf32>
    %c0_16 = arith.constant 0 : index
    %27 = arith.index_cast %7 : i32 to index
    %28 = vector.load %arg8[%c0_16, %27] : memref<1x256xf32, #tpu.memory_space<vmem>>, vector<1x256xf32>
    tpu.vector_store %arg8[%c0_16, %27], %26 {strides = array<i32>} : memref<1x256xf32, #tpu.memory_space<vmem>>, vector<1x256xf32>,
    %c1_i32 = arith.constant 1 : i32
    return
  }
  func.func @transform_0(%arg0: i32) -> (i32, i32) {
    %c0_i32 = arith.constant 0 : i32
    %c0_i32_0 = arith.constant 0 : i32
    return %c0_i32, %arg0 : i32, i32
  }
  func.func @transform_1(%arg0: i32) -> (i32, i32) {
    %c0_i32 = arith.constant 0 : i32
    %c0_i32_0 = arith.constant 0 : i32
    %c0_i32_1 = arith.constant 0 : i32
    return %c0_i32, %c0_i32_0 : i32, i32
  }
  func.func @transform_2(%arg0: i32) -> (i32, i32) {
    %c0_i32 = arith.constant 0 : i32
    %c0_i32_0 = arith.constant 0 : i32
    %c0_i32_1 = arith.constant 0 : i32
    return %c0_i32, %c0_i32_0 : i32, i32
  }
  func.func @transform_3(%arg0: i32) -> (i32, i32) {
    %c0_i32 = arith.constant 0 : i32
    %c0_i32_0 = arith.constant 0 : i32
    %c0_i32_1 = arith.constant 0 : i32
    return %c0_i32, %c0_i32_0 : i32, i32
  }
  func.func @transform_4(%arg0: i32) -> (i32, i32) {
    %c0_i32 = arith.constant 0 : i32
    %c0_i32_0 = arith.constant 0 : i32
    %c0_i32_1 = arith.constant 0 : i32
    return %c0_i32, %c0_i32_0 : i32, i32
  }
  func.func @transform_5(%arg0: i32) -> (i32, i32) {
    %c0_i32 = arith.constant 0 : i32
    %c0_i32_0 = arith.constant 0 : i32
    %c0_i32_1 = arith.constant 0 : i32
    return %c0_i32, %c0_i32_0 : i32, i32
  }
  func.func @transform_6(%arg0: i32) -> (i32, i32) {
    %c0_i32 = arith.constant 0 : i32
    %c0_i32_0 = arith.constant 0 : i32
    %c0_i32_1 = arith.constant 0 : i32
    return %c0_i32, %c0_i32_0 : i32, i32
  }
  func.func @transform_7(%arg0: i32) -> (i32, i32) {
    %c0_i32 = arith.constant 0 : i32
    %c0_i32_0 = arith.constant 0 : i32
    return %c0_i32, %arg0 : i32, i32
  }
}

</mosaic_0001>

<bundles_post_ra>
// kernel: tpu_custom_call.1
= control target key start
LH: loop header
LB: loop body
LE: loop exit
PB: predicated region body
PF: predicated region fallthrough
CT: control target
= control target key end

     0   :  { %s1065_s0 = inlined_call_operand.vmem [shape: bf16[30,256], index: 0, kind: input, shape index: {}]   ;;  %s1066_s1 = inlined_call_operand.vmem [shape: bf16[128,30], index: 1, kind: input, shape index: {}]   ;;  %s1067_s2 = inlined_call_operand.vmem [shape: f32[128,1], index: 2, kind: input, shape index: {}]   ;;  %s1068_s3 = inlined_call_operand.vmem [shape: bf16[64,128], index: 3, kind: input, shape index: {}]   ;;  %s1069_s4 = inlined_call_operand.vmem [shape: f32[64,1], index: 4, kind: input, shape index: {}]   ;;  %s1070_s5 = inlined_call_operand.vmem [shape: f32[64,1], index: 5, kind: input, shape index: {}]   ;;  %s1071_s6 = inlined_call_operand.<no memory space> [shape: f32[1,1], index: 6, kind: input, shape index: {}]   ;;  %s1072_s7 = inlined_call_operand.hbm [shape: f32[1,256], index: 7, kind: output, shape index: {}]  }
   0x1   :  { %v12_v0 = vstv %s1071_s6 }
   0x2   :  { %13 = vst [vmem:[#allocation2] sm:$0x1] %v12_v0 }
   0x3   :  { %v735_v1 = vld [vmem:[%s1065_s0 + $0x14] ss:$8 sps:$4 sm:$0x7f]   ;;  %vm254_vm0 = vcmask 1046528   ;;  %v738_v3 = vld [vmem:[%s1065_s0 + $0x4] ss:$8 sps:$4 sm:$0xff]  }
   0x4   :  { %v737_v2 = vld [vmem:[%s1065_s0 + $0x10] ss:$8 sps:$4 sm:$0x7f]   ;;  %717 = vmatprep.subr.msk.bf16.mxu0 %vm254_vm0, %v735_v1  ;;  %v775_v5 = vmov 0   ;;  %v740_v6 = vld [vmem:[%s1065_s0] ss:$8 sps:$4 sm:$0xff]  }
   0x5   :  { %v256_v4 = vsel %vm254_vm0, %v737_v2, 0  ;;  %293 = vmatprep.mubr.bf16.mxu0 %v775_v5  ;;  %733 = vset.pattern.permute.xlu0 %v775_v5  ;;  %v741_v7 = vld [vmem:[%s1066_s1] sm:$0xff]   ;;  %vm229_vm1 = vcmask 244736   ;;  %v68_v8 = vld [vmem:[%s1067_s2 + $0x70] sm:$0xff]  ;;  %v69_v10 = vld [vmem:[%s1067_s2 + $0x78] sm:$0xff] }
   0x6   :  { %274 = vmatpush1.bf16.msra.mxu0 %v256_v4  ;;  %734 = vset.pattern.permute.xlu1 %v775_v5  ;;  %v66_v9 = vld [vmem:[%s1067_s2 + $0x60] sm:$0xff]  ;;  %v67_v11 = vld [vmem:[%s1067_s2 + $0x68] sm:$0xff]  ;;  %v64_v13 = vld [vmem:[%s1067_s2 + $0x50] sm:$0xff] }
   0x7   :  { %275 = vmatprep.subr.bf16.mxu0 %v738_v3  ;;  %518 = vmatprep.mubr.bf16.mxu1 %v775_v5  ;;  %v742_v12 = vld [vmem:[%s1066_s1 + $0x8] sm:$0xff]   ;;  %v65_v14 = vld [vmem:[%s1067_s2 + $0x58] sm:$0xff]  ;;  %v62_v15 = vld [vmem:[%s1067_s2 + $0x40] sm:$0xff] }
   0x8   :  { %163 = vperm.xlu0 %733, %v68_v8   ;;  %153 = vperm.xlu1 %734, %v66_v9   ;;  %v63_v16 = vld [vmem:[%s1067_s2 + $0x48] sm:$0xff]  ;;  %v743_v17 = vld [vmem:[%s1066_s1 + $0x10] sm:$0xff]   ;;  %v61_v19 = vld [vmem:[%s1067_s2 + $0x38] sm:$0xff] }
   0x9   :  { %v60_v18 = vld [vmem:[%s1067_s2 + $0x30] sm:$0xff] }
   0xa   :  { %276 = vmatpush1.bf16.msra.mxu0 %v740_v6 }
   0xc   :  { %168 = vperm.xlu0 %733, %v69_v10   ;;  %158 = vperm.xlu1 %734, %v67_v11  }
   0xd   :  { %718 = vmatmul.mubr.msk.bf16.vlgmr.msra.gmra.mxu0 %vm229_vm1, %v741_v7 }
   0xe   :  { %303 = vmatprep.mubr.bf16.mxu0 %v775_v5 }
  0x10   :  { %143 = vperm.xlu0 %733, %v64_v13   ;;  %148 = vperm.xlu1 %734, %v65_v14  }
  0x14   :  { %133 = vperm.xlu0 %733, %v62_v15   ;;  %138 = vperm.xlu1 %734, %v63_v16  }
  0x15   :  { %719 = vmatmul.mubr.msk.bf16.gmra.mxu0 %vm229_vm1, %v742_v12 }
  0x16   :  { %313 = vmatprep.mubr.bf16.mxu0 %v775_v5 }
  0x17   :  { %14 = vsyncpa [#allocation4], 0  ;;  %v58_v20 = vld [vmem:[%s1067_s2 + $0x20] sm:$0xff]  ;;  %v59_v21 = vld [vmem:[%s1067_s2 + $0x28] sm:$0xff] }
  0x18   :  { %123 = vperm.xlu0 %733, %v60_v18   ;;  %128 = vperm.xlu1 %734, %v61_v19   ;;  %v744_v22 = vld [vmem:[%s1066_s1 + $0x18] sm:$0xff]   ;;  %v56_v23 = vld [vmem:[%s1067_s2 + $0x10] sm:$0xff]  ;;  %v54_v25 = vld [vmem:[%s1067_s2] sm:$0xff] }
  0x19   :  { %v57_v24 = vld [vmem:[%s1067_s2 + $0x18] sm:$0xff]  ;;  %v55_v26 = vld [vmem:[%s1067_s2 + $0x8] sm:$0xff]  ;;  %v745_v27 = vld [vmem:[%s1066_s1 + $0x20] sm:$0xff]  }
  0x1a   :  { %v70_v28 = vld [vmem:[%s1069_s4] sm:$0xff]  ;;  %v71_v29 = vld [vmem:[%s1069_s4 + $0x8] sm:$0xff]  ;;  %v72_v30 = vld [vmem:[%s1069_s4 + $0x10] sm:$0xff] }
  0x1b   :  { %v73_v31 = vld [vmem:[%s1069_s4 + $0x18] sm:$0xff]  ;;  %v746_v32 = vld [vmem:[%s1066_s1 + $0x28] sm:$0xff]   ;;  %v78_v33 = vld [vmem:[%s1070_s5] sm:$0xff] }
  0x1c   :  { %113 = vperm.xlu0 %733, %v58_v20   ;;  %118 = vperm.xlu1 %734, %v59_v21   ;;  %v79_v34 = vld [vmem:[%s1070_s5 + $0x8] sm:$0xff]  ;;  %v74_v35 = vld [vmem:[%s1069_s4 + $0x20] sm:$0xff]  ;;  %v80_v36 = vld [vmem:[%s1070_s5 + $0x10] sm:$0xff] }
  0x1d   :  { %720 = vmatmul.mubr.msk.bf16.gmra.mxu0 %vm229_vm1, %v743_v17  ;;  %v747_v37 = vld [vmem:[%s1066_s1 + $0x30] sm:$0xff]   ;;  %v75_v38 = vld [vmem:[%s1069_s4 + $0x28] sm:$0xff]  ;;  %v81_v39 = vld [vmem:[%s1070_s5 + $0x18] sm:$0xff] }
  0x1e   :  { %323 = vmatprep.mubr.bf16.mxu0 %v775_v5  ;;  %v76_v40 = vld [vmem:[%s1069_s4 + $0x30] sm:$0xff]  ;;  %v82_v41 = vld [vmem:[%s1070_s5 + $0x20] sm:$0xff]  ;;  %v748_v42 = vld [vmem:[%s1066_s1 + $0x38] sm:$0xff]  }
  0x1f   :  { %v77_v43 = vld [vmem:[%s1069_s4 + $0x38] sm:$0xff]  ;;  %v83_v44 = vld [vmem:[%s1070_s5 + $0x28] sm:$0xff]  ;;  %v84_v45 = vld [vmem:[%s1070_s5 + $0x30] sm:$0xff] }
  0x20   :  { %103 = vperm.xlu0 %733, %v56_v23   ;;  %108 = vperm.xlu1 %734, %v57_v24   ;;  %v85_v46 = vld [vmem:[%s1070_s5 + $0x38] sm:$0xff]  ;;  %v86_v47 = vld [vmem:[#allocation2] sm:$0x1] }
  0x24   :  { %93 = vperm.xlu0 %733, %v54_v25   ;;  %98 = vperm.xlu1 %734, %v55_v26  }
  0x25   :  { %721 = vmatmul.mubr.msk.bf16.gmra.mxu0 %vm229_vm1, %v744_v22 }
  0x26   :  { %333 = vmatprep.mubr.bf16.mxu0 %v775_v5 }
  0x28   :  { %424 = vperm.xlu0 %733, %v70_v28   ;;  %429 = vperm.xlu1 %734, %v71_v29  }
  0x2c   :  { %434 = vperm.xlu0 %733, %v72_v30   ;;  %439 = vperm.xlu1 %734, %v73_v31  }
  0x2d   :  { %722 = vmatmul.mubr.msk.bf16.gmra.mxu0 %vm229_vm1, %v745_v27 }
  0x2e   :  { %343 = vmatprep.mubr.bf16.mxu0 %v775_v5 }
  0x30   :  { %577 = vperm.xlu0 %733, %v78_v33   ;;  %582 = vperm.xlu1 %734, %v79_v34  }
  0x34   :  { %444 = vperm.xlu0 %733, %v74_v35   ;;  %587 = vperm.xlu1 %734, %v80_v36  }
  0x35   :  { %723 = vmatmul.mubr.msk.bf16.gmra.mxu0 %vm229_vm1, %v746_v32 }
  0x36   :  { %353 = vmatprep.mubr.bf16.mxu0 %v775_v5 }
  0x38   :  { %449 = vperm.xlu0 %733, %v75_v38   ;;  %592 = vperm.xlu1 %734, %v81_v39  }
  0x3c   :  { %454 = vperm.xlu0 %733, %v76_v40   ;;  %597 = vperm.xlu1 %734, %v82_v41  }
  0x3d   :  { %724 = vmatmul.mubr.msk.bf16.gmra.mxu0 %vm229_vm1, %v747_v37 }
  0x3e   :  { %363 = vmatprep.mubr.bf16.mxu0 %v775_v5 }
  0x40   :  { %459 = vperm.xlu0 %733, %v77_v43   ;;  %602 = vperm.xlu1 %734, %v83_v44  }
  0x44   :  { %607 = vperm.xlu0 %733, %v84_v45   ;;  %612 = vperm.xlu1 %734, %v85_v46  }
  0x45   :  { %725 = vmatmul.mubr.msk.bf16.gmra.mxu0 %vm229_vm1, %v748_v42 }
  0x48   :  { %659 = vperm.xlu0 %733, %v86_v47  }
  0x83   :  { %v972_v48 = vpop.permute.xlu0 %163  ;;  %v974_v49 = vpop.permute.xlu1 %153 }
  0x87   :  { %v976_v50 = vpop.permute.xlu0 %168  ;;  %v978_v51 = vpop.permute.xlu1 %158 }
  0x8b   :  { %v980_v52 = vpop.permute.xlu0 %143  ;;  %v982_v53 = vpop.permute.xlu1 %148 }
  0x8f   :  { %v984_v54 = vpop.permute.xlu0 %133  ;;  %v986_v55 = vpop.permute.xlu1 %138 }
  0x93   :  { %v988_v56 = vpop.permute.xlu0 %123  ;;  %v990_v57 = vpop.permute.xlu1 %128 }
  0x97   :  { %v992_v58 = vpop.permute.xlu0 %113  ;;  %v994_v59 = vpop.permute.xlu1 %118 }
  0x9b   :  { %v104_v60 = vpop.permute.xlu0 %103  ;;  %v109_v61 = vpop.permute.xlu1 %108 }
  0x9f   :  { %v94_v62 = vpop.permute.xlu0 %93  ;;  %v99_v1 = vpop.permute.xlu1 %98 }
  0xcd   :  { %v295_v63 = vpop.f32.mrf.mxu0 }
  0xce   :  { %v296_v2 = vadd.f32 %v295_v63, %v94_v62 }
  0xcf   :  { %v297_v0 = vpop.f32.mrf.mxu0 }
  0xd0   :  { %v298_v4 = vadd.f32 %v297_v0, %v94_v62  ;;  %v374_v8 = vmax.f32 %v296_v2, 0.0 }
  0xd1   :  { %v299_v3 = vpop.f32.mrf.mxu0 }
  0xd2   :  { %v300_v6 = vadd.f32 %v299_v3, %v99_v1  ;;  %v375_v12 = vmax.f32 %v298_v4, 0.0 }
  0xd3   :  { %v301_v7 = vpop.f32.mrf.mxu0 }
  0xd4   :  { %v376_v9 = vmax.f32 %v300_v6, 0.0  ;;  %v302_v10 = vadd.f32 %v301_v7, %v99_v1 }
  0xd5   :  { %v305_v11 = vpop.f32.mrf.mxu0 }
  0xd6   :  { %v996_v13 = vpack.c.bf16 %v376_v9, %v374_v8  ;;  %v377_v14 = vmax.f32 %v302_v10, 0.0  ;;  %v306_v17 = vadd.f32 %v305_v11, %v104_v60 }
  0xd7   :  { %v307_v15 = vpop.f32.mrf.mxu0 }
  0xd8   :  { %v998_v16 = vpack.c.bf16 %v377_v14, %v375_v12  ;;  %v308_v19 = vadd.f32 %v307_v15, %v104_v60  ;;  %v378_v22 = vmax.f32 %v306_v17, 0.0 }
  0xd9   :  { %v309_v18 = vpop.f32.mrf.mxu0 }
  0xda   :  { %v310_v20 = vadd.f32 %v309_v18, %v109_v61  ;;  %v379_v26 = vmax.f32 %v308_v19, 0.0 }
  0xdb   :  { %v311_v21 = vpop.f32.mrf.mxu0 }
  0xdc   :  { %v380_v23 = vmax.f32 %v310_v20, 0.0  ;;  %v312_v24 = vadd.f32 %v311_v21, %v109_v61 }
  0xdd   :  { %v1000_v25 = vpop.f32.mrf.mxu0 }
  0xde   :  { %v1002_v27 = vpack.c.bf16 %v380_v23, %v378_v22  ;;  %v381_v28 = vmax.f32 %v312_v24, 0.0 }
  0xdf   :  { %v1004_v29 = vpop.f32.mrf.mxu0 }
  0xe0   :  { %v1006_v30 = vpack.c.bf16 %v381_v28, %v379_v26 }
  0xe1   :  { %v1008_v31 = vpop.f32.mrf.mxu0 }
  0xe3   :  { %v1010_v32 = vpop.f32.mrf.mxu0 }
  0xe5   :  { %v1012_v33 = vpop.f32.mrf.mxu0 }
  0xe7   :  { %v327_v34 = vpop.f32.mrf.mxu0 }
  0xe9   :  { %v329_v35 = vpop.f32.mrf.mxu0 }
  0xeb   :  { %v331_v36 = vpop.f32.mrf.mxu0 }
  0xed   :  { %v335_v37 = vpop.f32.mrf.mxu0 }
  0xef   :  { %v337_v38 = vpop.f32.mrf.mxu0 }
  0xf1   :  { %v339_v39 = vpop.f32.mrf.mxu0 }
  0xf3   :  { %v341_v40 = vpop.f32.mrf.mxu0 }
  0xf5   :  { %v345_v41 = vpop.f32.mrf.mxu0 }
  0xf6   :  { %v346_v24 = vadd.f32 %v345_v41, %v980_v52 }
  0xf7   :  { %v347_v42 = vpop.f32.mrf.mxu0 }
  0xf8   :  { %v348_v18 = vadd.f32 %v347_v42, %v980_v52  ;;  %v340_v42 = vadd.f32 %v339_v39, %v986_v55  ;;  %v328_v52 = vadd.f32 %v327_v34, %v988_v56 }
  0xf9   :  { %v349_v43 = vpop.f32.mrf.mxu0 }
  0xfa   :  { %v350_v20 = vadd.f32 %v349_v43, %v982_v53  ;;  %v395_v28 = vmax.f32 %v348_v18, 0.0  ;;  %v387_v34 = vmax.f32 %v328_v52, 0.0 }
  0xfb   :  { %v351_v44 = vpop.f32.mrf.mxu0 }
  0xfc   :  { %v352_v10 = vadd.f32 %v351_v44, %v982_v53  ;;  %v396_v44 = vmax.f32 %v350_v20, 0.0  ;;  %v332_v53 = vadd.f32 %v331_v36, %v990_v57  ;;  %v326_v36 = vadd.f32 %v1012_v33, %v988_v56 }
  0xfd   :  { %v355_v45 = vpop.f32.mrf.mxu0 }
  0xfe   :  { %v356_v15 = vadd.f32 %v355_v45, %v974_v49  ;;  %v389_v39 = vmax.f32 %v332_v53, 0.0 }
  0xff   :  { %v357_v46 = vpop.f32.mrf.mxu0 }
 0x100   :  { %v358_v6 = vadd.f32 %v357_v46, %v974_v49  ;;  %v398_v26 = vmax.f32 %v356_v15, 0.0  ;;  %v338_v49 = vadd.f32 %v337_v38, %v984_v54  ;;  %v330_v38 = vadd.f32 %v329_v35, %v990_v57 }
 0x101   :  { %v359_v47 = vpop.f32.mrf.mxu0  ;;  %v320_v57 = vadd.f32 %v1008_v31, %v994_v59 }
 0x102   :  { %v360_v8 = vadd.f32 %v359_v47, %v978_v51  ;;  %v399_v19 = vmax.f32 %v358_v6, 0.0  ;;  %v394_v47 = vmax.f32 %v346_v24, 0.0  ;;  %v391_v41 = vmax.f32 %v338_v49, 0.0 }
 0x103   :  { %v361_v60 = vpop.f32.mrf.mxu0  ;;  %v388_v35 = vmax.f32 %v330_v38, 0.0  ;;  %v384_v33 = vmax.f32 %v320_v57, 0.0 }
 0x104   :  { %v362_v0 = vadd.f32 %v361_v60, %v978_v51  ;;  %v400_v21 = vmax.f32 %v360_v8, 0.0  ;;  %v397_v51 = vmax.f32 %v352_v10, 0.0  ;;  %v392_v60 = vmax.f32 %v340_v42, 0.0 }
 0x105   :  { %v365_v61 = vpop.f32.mrf.mxu0 }
 0x106   :  { %v366_v3 = vadd.f32 %v365_v61, %v972_v48  ;;  %v401_v11 = vmax.f32 %v362_v0, 0.0  ;;  %v418_v45 = vpack.c.bf16 %v400_v21, %v398_v26  ;;  %v417_v46 = vpack.c.bf16 %v397_v51, %v395_v28 }
 0x107   :  { %v367_v62 = vpop.f32.mrf.mxu0  ;;  %v416_v61 = vpack.c.bf16 %v396_v44, %v394_v47 }
 0x108   :  { %v368_v1 = vadd.f32 %v367_v62, %v972_v48  ;;  %v402_v17 = vmax.f32 %v366_v3, 0.0  ;;  %v419_v23 = vpack.c.bf16 %v401_v11, %v399_v19 }
 0x109   :  { %v369_v63 = vpop.f32.mrf.mxu0 }
 0x10a   :  { %v370_v2 = vadd.f32 %v369_v63, %v976_v50  ;;  %v403_v12 = vmax.f32 %v368_v1, 0.0  ;;  %v413_v1 = vpack.c.bf16 %v389_v39, %v387_v34 }
 0x10b   :  { %v371_v4 = vpop.f32.mrf.mxu0 }
 0x10c   :  { %v372_v7 = vadd.f32 %v371_v4, %v976_v50  ;;  %v404_v9 = vmax.f32 %v370_v2, 0.0  ;;  %v342_v50 = vadd.f32 %v341_v40, %v986_v55  ;;  %v336_v40 = vadd.f32 %v335_v37, %v984_v54 }
 0x10d   :  { %v322_v55 = vadd.f32 %v1010_v32, %v994_v59  ;;  %v318_v54 = vadd.f32 %v1004_v29, %v992_v58  ;;  %v316_v32 = vadd.f32 %v1000_v25, %v992_v58  ;;  %v386_v2 = vmax.f32 %v326_v36, 0.0  ;;  %v749_v58 = vld [vmem:[%s1068_s3] sm:$0xff]   ;;  %v750_v59 = vld [vmem:[%s1068_s3 + $0x8] sm:$0xff]   ;;  %v425_v25 = vpop.permute.xlu0 %424 }
 0x10e   :  { %v405_v14 = vmax.f32 %v372_v7, 0.0  ;;  %v420_v22 = vpack.c.bf16 %v404_v9, %v402_v17  ;;  %v393_v43 = vmax.f32 %v342_v50, 0.0  ;;  %v390_v63 = vmax.f32 %v336_v40, 0.0 }
 0x10f   :  { %v385_v0 = vmax.f32 %v322_v55, 0.0  ;;  %v383_v56 = vmax.f32 %v318_v54, 0.0  ;;  %v412_v3 = vpack.c.bf16 %v388_v35, %v386_v2  ;;  %v382_v29 = vmax.f32 %v316_v32, 0.0 }
 0x110   :  { %v421_v48 = vpack.c.bf16 %v405_v14, %v403_v12  ;;  %v415_v62 = vpack.c.bf16 %v393_v43, %v391_v41  ;;  %v414_v37 = vpack.c.bf16 %v392_v60, %v390_v63 }
 0x111   :  { %v411_v4 = vpack.c.bf16 %v385_v0, %v383_v56  ;;  %v410_v6 = vpack.c.bf16 %v384_v33, %v382_v29 }
 0x112   :  { %486 = vmatprep.subr.bf16.mxu1 %v421_v48 }
 0x113   :  { %487 = vmatpush1.bf16.msra.mxu1 %v420_v22 }
 0x114   :  { %488 = vmatprep.subr.bf16.mxu1 %v419_v23 }
 0x117   :  { %489 = vmatpush1.bf16.msra.mxu1 %v418_v45 }
 0x118   :  { %490 = vmatprep.subr.bf16.mxu1 %v417_v46 }
 0x11b   :  { %491 = vmatpush1.bf16.msra.mxu1 %v416_v61 }
 0x11c   :  { %492 = vmatprep.subr.bf16.mxu1 %v415_v62 }
 0x11f   :  { %493 = vmatpush1.bf16.msra.mxu1 %v414_v37 }
 0x120   :  { %494 = vmatprep.subr.bf16.mxu1 %v413_v1 }
 0x123   :  { %495 = vmatpush1.bf16.msra.mxu1 %v412_v3 }
 0x124   :  { %496 = vmatprep.subr.bf16.mxu1 %v411_v4 }
 0x127   :  { %497 = vmatpush1.bf16.msra.mxu1 %v410_v6 }
 0x128   :  { %498 = vmatprep.subr.bf16.mxu1 %v1006_v30  ;;  %v435_v30 = vpop.permute.xlu0 %434 }
 0x12b   :  { %499 = vmatpush1.bf16.msra.mxu1 %v1002_v27  ;;  %v430_v27 = vpop.permute.xlu1 %429 }
 0x12c   :  { %500 = vmatprep.subr.bf16.mxu1 %v998_v16  ;;  %v751_v16 = vld [vmem:[%s1068_s3 + $0x10] sm:$0xff]   ;;  %v578_v7 = vpop.permute.xlu0 %577 }
 0x12f   :  { %501 = vmatpush1.bf16.msra.mxu1 %v996_v13  ;;  %v752_v13 = vld [vmem:[%s1068_s3 + $0x18] sm:$0xff]   ;;  %v440_v31 = vpop.permute.xlu1 %439  ;;  %s777_s3 = smov [#allocation3]  }
 0x130   :  { %v445_v11 = vpop.permute.xlu0 %444  ;;  %s697_s17 = sshll.u32 %s777_s3, 4  ;;  %s698_s17 = int_to_ptr.vmem [resolvable:$true] %s697_s17 }
 0x131   :  { %s753_s18 = scalar_lea.vmem %s698_s17, 32  ;;  %p758_p1 = scmp.lt.s32.totalorder %s698_s17, %s698_s17 }
 0x132   :  { %519 = vmatmul.mubr.bf16.vlgmr.msra.gmra.mxu1 %v749_v58  ;;  %p754_p0 = scmp.ne.s32.totalorder %s698_s17, %s753_s18  ;;  %p759_p2 = scmp.lt.s32.totalorder %s753_s18, %s753_s18 }
 0x133   :  { %528 = vmatprep.mubr.bf16.mxu1 %v775_v5  ;;  %v583_v9 = vpop.permute.xlu1 %582 }
 0x134   :  { %v450_v18 = vpop.permute.xlu0 %449  ;;  %p760_p3 = por %p759_p2, %p758_p1 }
 0x136   :  { %p761_p4 = pnand %p760_p3, %p754_p0 }
 0x137   :  { %v588_v15 = vpop.permute.xlu1 %587 }
 0x138   :  { %v455_v42 = vpop.permute.xlu0 %454 }
 0x13a   :  { %529 = vmatmul.mubr.bf16.gmra.mxu1 %v750_v59 }
 0x13b   :  { %538 = vmatprep.mubr.bf16.mxu1 %v775_v5  ;;  %v593_v51 = vpop.permute.xlu1 %592 }
 0x13c   :  { %v460_v35 = vpop.permute.xlu0 %459 }
 0x13f   :  { %v598_v55 = vpop.permute.xlu1 %597 }
 0x142   :  { %539 = vmatmul.mubr.bf16.gmra.mxu1 %v751_v16 }
 0x143   :  { %548 = vmatprep.mubr.bf16.mxu1 %v775_v5 }
 0x14a   :  { %549 = vmatmul.mubr.bf16.gmra.mxu1 %v752_v13  ;;  %v603_v13 = vpop.permute.xlu1 %602 }
 0x1f2   :  { %v520_v8 = vpop.f32.mrf.mxu1 }
 0x1f3   :  { %v521_v48 = vadd.f32 %v520_v8, %v425_v25 }
 0x1f4   :  { %v522_v10 = vpop.f32.mrf.mxu1 }
 0x1f5   :  { %v523_v50 = vadd.f32 %v522_v10, %v425_v25  ;;  %v559_v28 = vmax.f32 %v521_v48, 0.0  ;;  %v608_v10 = vpop.permute.xlu0 %607 }
 0x1f6   :  { %v524_v12 = vpop.f32.mrf.mxu1 }
 0x1f7   :  { %v525_v5 = vadd.f32 %v524_v12, %v430_v27  ;;  %v560_v46 = vmax.f32 %v523_v50, 0.0  ;;  %v615_v60 = vmul.f32 %v578_v7, %v559_v28 }
 0x1f8   :  { %v526_v14 = vpop.f32.mrf.mxu1 }
 0x1f9   :  { %v527_v20 = vadd.f32 %v526_v14, %v430_v27  ;;  %v561_v23 = vmax.f32 %v525_v5, 0.0  ;;  %v616_v34 = vmul.f32 %v578_v7, %v560_v46 }
 0x1fa   :  { %v530_v17 = vpop.f32.mrf.mxu1 }
 0x1fb   :  { %v531_v21 = vadd.f32 %v530_v17, %v435_v30  ;;  %v562_v44 = vmax.f32 %v527_v20, 0.0  ;;  %v617_v47 = vmul.f32 %v583_v9, %v561_v23 }
 0x1fc   :  { %v532_v19 = vpop.f32.mrf.mxu1 }
 0x1fd   :  { %v533_v24 = vadd.f32 %v532_v19, %v435_v30  ;;  %v563_v45 = vmax.f32 %v531_v21, 0.0  ;;  %v618_v39 = vmul.f32 %v583_v9, %v562_v44  ;;  %v631_v37 = vadd.f32 %v617_v47, %v615_v60 }
 0x1fe   :  { %v534_v22 = vpop.f32.mrf.mxu1 }
 0x1ff   :  { %v535_v26 = vadd.f32 %v534_v22, %v440_v31  ;;  %v564_v52 = vmax.f32 %v533_v24, 0.0  ;;  %v619_v62 = vmul.f32 %v588_v15, %v563_v45  ;;  %v644_v3 = vadd.f32 %v618_v39, %v616_v34 }
 0x200   :  { %v536_v49 = vpop.f32.mrf.mxu1  ;;  %v662_v45 = vlaneseq }
 0x201   :  { %v537_v53 = vadd.f32 %v536_v49, %v440_v31  ;;  %v565_v41 = vmax.f32 %v535_v26, 0.0  ;;  %v620_v0 = vmul.f32 %v588_v15, %v564_v52  ;;  %v632_v4 = vadd.f32 %v631_v37, %v619_v62 }
 0x202   :  { %v540_v43 = vpop.f32.mrf.mxu1  ;;  %v663_v47 = vshrl.u32 %v662_v45, 7  ;;  %vm688_vm2 = vcmp.lt.s32.totalorder %v662_v45, 256 }
 0x203   :  { %v541_v40 = vadd.f32 %v540_v43, %v445_v11  ;;  %v566_v36 = vmax.f32 %v537_v53, 0.0  ;;  %v621_v1 = vmul.f32 %v593_v51, %v565_v41  ;;  %v645_v25 = vadd.f32 %v644_v3, %v620_v0 }
 0x204   :  { %v542_v38 = vpop.f32.mrf.mxu1  ;;  %v664_v39 = vsub.s32 0, %v663_v47 }
 0x205   :  { %v543_v61 = vadd.f32 %v542_v38, %v445_v11  ;;  %v567_v63 = vmax.f32 %v541_v40, 0.0  ;;  %v622_v29 = vmul.f32 %v593_v51, %v566_v36  ;;  %v633_v27 = vadd.f32 %v632_v4, %v621_v1  ;;  %v613_v51 = vpop.permute.xlu1 %612 }
 0x206   :  { %v544_v54 = vpop.f32.mrf.mxu1 }
 0x207   :  { %v545_v57 = vadd.f32 %v544_v54, %v450_v18  ;;  %v568_v32 = vmax.f32 %v543_v61, 0.0  ;;  %v623_v6 = vmul.f32 %v598_v55, %v567_v63  ;;  %v646_v11 = vadd.f32 %v645_v25, %v622_v29  ;;  %v660_v63 = vpop.permute.xlu0 %659 }
 0x208   :  { %v546_v2 = vpop.f32.mrf.mxu1  ;;  %v776_v61 = vmov 1966171168  }
 0x209   :  { %v569_v56 = vmax.f32 %v545_v57, 0.0  ;;  %v547_v33 = vadd.f32 %v546_v2, %v450_v18  ;;  %v624_v30 = vmul.f32 %v598_v55, %v568_v32  ;;  %v634_v12 = vadd.f32 %v633_v27, %v623_v6 }
 0x20a   :  { %v550_v58 = vpop.f32.mrf.mxu1  ;;  %v672_v55 = vunpack.c.l.s4 %v776_v61 }
 0x20b   :  { %v570_v59 = vmax.f32 %v547_v33, 0.0  ;;  %v551_v16 = vadd.f32 %v550_v58, %v455_v42  ;;  %v625_v7 = vmul.f32 %v603_v13, %v569_v56  ;;  %v647_v19 = vadd.f32 %v646_v11, %v624_v30 }
 0x20c   :  { %v552_v31 = vpop.f32.mrf.mxu1  ;;  %v673_v57 = vunpack.c.0.s8 %v672_v55 }
 0x20d   :  { %v571_v8 = vmax.f32 %v551_v16, 0.0  ;;  %v553_v9 = vadd.f32 %v552_v31, %v455_v42  ;;  %v626_v15 = vmul.f32 %v603_v13, %v570_v59  ;;  %v635_v20 = vadd.f32 %v634_v12, %v625_v7 }
 0x20e   :  { %v554_v14 = vpop.f32.mrf.mxu1  ;;  %v676_v32 = vsub.s32 %v673_v57, %v663_v47 }
 0x20f   :  { %v627_v17 = vmul.f32 %v608_v10, %v571_v8  ;;  %v572_v18 = vmax.f32 %v553_v9, 0.0  ;;  %v555_v5 = vadd.f32 %v554_v14, %v460_v35  ;;  %v648_v23 = vadd.f32 %v647_v19, %v626_v15 }
 0x210   :  { %v556_v48 = vpop.f32.mrf.mxu1 }
 0x211   :  { %v628_v21 = vmul.f32 %v608_v10, %v572_v18  ;;  %v573_v22 = vmax.f32 %v555_v5, 0.0  ;;  %v557_v50 = vadd.f32 %v556_v48, %v460_v35  ;;  %v636_v24 = vadd.f32 %v635_v20, %v627_v17 }
 0x212   :  { %v665_v35 = vrot.slane %v660_v63, %v664_v39 }
 0x213   :  { %v629_v26 = vmul.f32 %v613_v51, %v573_v22  ;;  %v574_v49 = vmax.f32 %v557_v50, 0.0  ;;  %v649_v28 = vadd.f32 %v648_v23, %v628_v21 }
 0x215   :  { %v637_v42 = vadd.f32 %v636_v24, %v629_v26  ;;  %v630_v44 = vmul.f32 %v613_v51, %v574_v49 }
 0x217   :  { %v638_v53 = vrot.slane %v637_v42, 4  ;;  %v650_v43 = vadd.f32 %v649_v28, %v630_v44 }
 0x219   :  { %v639_v46 = vadd.f32 %v638_v53, %v637_v42  ;;  %v651_v40 = vrot.slane %v650_v43, 4 }
 0x21b   :  { %v640_v52 = vrot.slane %v639_v46, 2  ;;  %v652_v41 = vadd.f32 %v651_v40, %v650_v43 }
 0x21d   :  { %v641_v38 = vadd.f32 %v640_v52, %v639_v46  ;;  %v653_v60 = vrot.slane %v652_v41, 2 }
 0x21f   :  { %v642_v62 = vrot.slane %v641_v38, 1  ;;  %v654_v36 = vadd.f32 %v653_v60, %v652_v41 }
 0x221   :  { %v643_v54 = vadd.f32 %v642_v62, %v641_v38  ;;  %v655_v34 = vrot.slane %v654_v36, 1 }
 0x223   :  { %v656_v37 = vadd.f32 %v655_v34, %v654_v36  ;;  %v666_v0 = vadd.f32 %v665_v35, %v643_v54 }
 0x225   :  { %v667_v1 = vadd.f32 %v665_v35, %v656_v37 }
 0x227   :  { %v670_v2 = vcombine.low %v666_v0, %v667_v1 }
 0x229   :  { %v677_v56 = vrot.slane %v670_v2, %v676_v32 }
 0x22b   :  { %v684_v33 = vrot.slane %v677_v56, %v676_v32 }
 0x22d   :  { %690 = vst.msk [vmem:[#allocation3] sm:$0x3] %vm688_vm2, %v684_v33 }
 0x22e   :  { %764 = shalt.err (!%p761_p4)
}
 0x22f   :  { %700 = dma.vmem_to_hbm [thread:$0]  %s698_s17, 32, %s1072_s7, [#allocation4]  }
 0x230   :  { %773 = dma.done.wait [#allocation4], 32  }
 0x231   :  { %774 = vsyncadd [#allocation4], 4294967264 }
 0x232   :  { %704 = vsyncpa [#allocation4], 1 }

</bundles_post_ra>
